<compile_context>
chip_gen: v7x
topology: tpu7x:2x2x1
jax: 0.10.0
libtpu: 0.0.40
codegen_flags: <defaults>
</compile_context>

<pallas_src>
import jax
import jax.numpy as jnp
from jax.experimental import pallas as pl
from jax.experimental.pallas import tpu as pltpu


def _critic_kernel(xt_ref, w1_ref, b1_ref, w2_ref, b2_ref, w3_ref, b3_ref, o_ref):
    # xt_ref: (S, TM)    batch tile, batch on the lane axis
    # w1_ref: (H, S)     PyTorch (out, in) layout (bf16 or f32)
    # b1_ref: (H, 1)     f32
    # w2_ref: (H, H)     (bf16 or f32)
    # b2_ref: (H, 1)     f32
    # w3_ref: (1, H)     f32 (final Linear weight)
    # b3_ref: (1, 1)     f32
    # o_ref:  (1, 1, TM) lane-dense output row for this tile

    # Layer 1: relu(W1 @ x^T + b1) -> (H, TM).  MXU matmul, f32 accumulation.
    h1 = jnp.dot(w1_ref[...], xt_ref[...], preferred_element_type=jnp.float32)
    h1 = jnp.maximum(h1 + b1_ref[...], 0.0)

    # Layer 2: relu(W2 @ h1 + b2) -> (H, TM).  Dominant matmul.
    h2 = jnp.dot(w2_ref[...], h1.astype(w2_ref.dtype),
                 preferred_element_type=jnp.float32)
    h2 = jnp.maximum(h2 + b2_ref[...], 0.0)

    # Layer 3 (out_features == 1): a single M=1 MXU matmul folds the
    # multiply + 128-deep reduce; result is a lane-dense (1, TM) row.
    out = jnp.dot(w3_ref[...], h2, preferred_element_type=jnp.float32)
    o_ref[0] = (out + b3_ref[...]).astype(o_ref.dtype)


def _default_tm(batch):
    """Batch tile heuristic: big tiles (step-overhead amortization), capped at
    4096 rows (VMEM budget, see header), and split into >= 2 tiles when there
    is enough work so the 'parallel' grid axis can shard across v7x's 2 TCs."""
    padded = pl.cdiv(batch, 128) * 128
    tm = min(padded, 4096)
    if tm == padded and padded >= 256:
        tm = pl.cdiv(padded // 2, 128) * 128
    return tm


def critic_forward(x, params, *, tm=None, use_bf16=True):
    """x: (batch, state_dim) float32 -> (batch,) float32."""
    w1, b1, w2, b2, w3, b3 = params
    b_sz, s_dim = x.shape
    hidden = w1.shape[0]

    if tm is None:
        tm = _default_tm(b_sz)
    grid_b = pl.cdiv(b_sz, tm)
    padded_b = grid_b * tm

    # Batch on the lane axis: (B, S) -> (S, B).  Cheap wrapper transpose; saves
    # 8x VMEM on the x double buffer vs a lane-padded (TM, 16) block.
    xt = x.T
    if padded_b != b_sz:
        # Zero-pad the (lane) batch axis to a tile multiple; pad rows produce
        # garbage that is sliced off below.
        # TODO(synk): could drop the pad and over-run the last block once
        # masked edge-write behavior for the (1,1,TM) output block is verified.
        xt = jnp.pad(xt, ((0, 0), (0, padded_b - b_sz)))

    if use_bf16:
        # bf16 MXU operands for the two big matmuls (v5e/v6e/v7x are all
        # bf16-native); accumulation stays f32.  Biases/w3 stay f32.
        xt = xt.astype(jnp.bfloat16)
        w1 = w1.astype(jnp.bfloat16)
        w2 = w2.astype(jnp.bfloat16)

    flops = 2 * padded_b * (s_dim * hidden + hidden * hidden + hidden)
    bytes_accessed = (
        xt.size * xt.dtype.itemsize
        + sum(int(p.size) * p.dtype.itemsize for p in (w1, b1, w2, b2, w3, b3))
        + padded_b * 4)

    const2 = lambda i: (0, 0)
    out = pl.pallas_call(
        _critic_kernel,
        out_shape=jax.ShapeDtypeStruct((grid_b, 1, tm), jnp.float32),
        grid=(grid_b,),
        in_specs=[
            pl.BlockSpec((s_dim, tm), lambda i: (0, i)),   # x tile (pipelined)
            pl.BlockSpec((hidden, s_dim), const2),         # w1 (VMEM-resident)
            pl.BlockSpec((hidden, 1), const2),             # b1
            pl.BlockSpec((hidden, hidden), const2),        # w2
            pl.BlockSpec((hidden, 1), const2),             # b2
            pl.BlockSpec((1, hidden), const2),             # w3
            pl.BlockSpec((1, 1), const2),                  # b3
        ],
        out_specs=pl.BlockSpec((1, 1, tm), lambda i: (i, 0, 0)),
        compiler_params=pltpu.CompilerParams(
            dimension_semantics=("parallel",)),
        cost_estimate=pl.CostEstimate(
            flops=flops, transcendentals=0, bytes_accessed=bytes_accessed),
    )(xt, w1, b1, w2, b2, w3, b3)

    # (G, 1, TM) -> (padded_b,) -> (batch,)  == PyTorch's squeeze(-1)
    return out.reshape(-1)[:b_sz]


def init_critic_params(key, state_dim, hidden_size=128):
    """PyTorch-default-style init: uniform(-1/sqrt(fan_in), 1/sqrt(fan_in)).

    w1/w2/w3 use nn.Linear's (out_features, in_features) layout; b1/b2 are
    stored as (H, 1) columns so they broadcast over the lane (batch) axis
    inside the kernel; b3 is (1, 1).
    """
    keys = jax.random.split(key, 6)

    def lin(kw, kb, fan_in, fan_out):
        bound = 1.0 / jnp.sqrt(jnp.float32(fan_in))
        w = jax.random.uniform(kw, (fan_out, fan_in), jnp.float32, -bound, bound)
        b = jax.random.uniform(kb, (fan_out, 1), jnp.float32, -bound, bound)
        return w, b

    w1, b1 = lin(keys[0], keys[1], state_dim, hidden_size)
    w2, b2 = lin(keys[2], keys[3], hidden_size, hidden_size)
    w3, b3 = lin(keys[4], keys[5], hidden_size, 1)   # w3: (1, H), b3: (1, 1)
    return (w1, b1, w2, b2, w3, b3)


def _reference(x, params, *, bf16=False):
    """Pure-JAX reference (standard batch-major formulation)."""
    w1, b1, w2, b2, w3, b3 = params
    if bf16:
        x = x.astype(jnp.bfloat16)
        w1 = w1.astype(jnp.bfloat16)
        w2 = w2.astype(jnp.bfloat16)
    h = jnp.dot(x, w1.T, preferred_element_type=jnp.float32) + b1[:, 0]
    h = jnp.maximum(h, 0.0)
    if bf16:
        h = h.astype(jnp.bfloat16)
    h = jnp.dot(h, w2.T, preferred_element_type=jnp.float32) + b2[:, 0]
    h = jnp.maximum(h, 0.0)
    return (jnp.dot(h, w3.T, preferred_element_type=jnp.float32) + b3)[:, 0]


if __name__ == "__main__":
    key = jax.random.PRNGKey(0)
    k_params, k_x = jax.random.split(key)

    batch = 200          # not a multiple of 128 -> exercises padding path;
                         # default TM heuristic gives TM=128, grid=2 (>=2 steps)
    state_dim = 16
    hidden_size = 128    # module default

    params = init_critic_params(k_params, state_dim, hidden_size)
    x = jax.random.normal(k_x, (batch, state_dim), jnp.float32)

    # Default path: bf16 MXU operands, f32 accumulation.
    out_bf16 = critic_forward(x, params)            # use_bf16=True by default
    jax.block_until_ready(out_bf16)

    # Tight-tolerance path: all-f32.
    out_f32 = critic_forward(x, params, use_bf16=False)
    jax.block_until_ready(out_f32)

    ref_f32 = _reference(x, params, bf16=False)
    ref_bf16 = _reference(x, params, bf16=True)

    assert out_bf16.shape == (batch,), out_bf16.shape
    assert out_f32.shape == (batch,), out_f32.shape

    # f32 kernel vs f32 reference: tight.
    assert jnp.allclose(out_f32, ref_f32, atol=1e-4, rtol=1e-4), float(
        jnp.max(jnp.abs(out_f32 - ref_f32)))
    # bf16 kernel vs bf16-matched reference: only accumulation-order noise.
    assert jnp.allclose(out_bf16, ref_bf16, atol=5e-3, rtol=5e-3), float(
        jnp.max(jnp.abs(out_bf16 - ref_bf16)))
    # bf16 kernel vs f32 reference: quantization-level tolerance.
    assert jnp.allclose(out_bf16, ref_f32, atol=5e-2, rtol=5e-2), float(
        jnp.max(jnp.abs(out_bf16 - ref_f32)))

    print("KERNEL_OK")
</pallas_src>

<mosaic_0001>
module attributes {stable_mosaic.version = 11 : i64} {
  func.func @_critic_kernel(%arg0: i32, %arg1: memref<16x128xbf16, #tpu.memory_space<vmem>>, %arg2: memref<128x16xbf16, #tpu.memory_space<vmem>>, %arg3: memref<128x1xf32, #tpu.memory_space<vmem>>, %arg4: memref<128x128xbf16, #tpu.memory_space<vmem>>, %arg5: memref<128x1xf32, #tpu.memory_space<vmem>>, %arg6: memref<1x128xf32, #tpu.memory_space<vmem>>, %arg7: memref<1x1xf32, #tpu.memory_space<vmem>>, %arg8: memref<1x1x128xf32, #tpu.memory_space<vmem>>) attributes {dimension_semantics = [#tpu.dimension_semantics<parallel>], iteration_bounds = array<i64: 2>, scalar_prefetch = 0 : i64, scratch_operands = 0 : i64, tpu.core_type = #tpu.core_type<tc>, window_params = [{transform_indices = @transform_0, window_bounds = array<i64: 16, 128>}, {pipeline_mode = #tpu.pipeline_mode<synchronous>, transform_indices = @transform_1, window_bounds = array<i64: 128, 16>}, {pipeline_mode = #tpu.pipeline_mode<synchronous>, transform_indices = @transform_2, window_bounds = array<i64: 128, 1>}, {pipeline_mode = #tpu.pipeline_mode<synchronous>, transform_indices = @transform_3, window_bounds = array<i64: 128, 128>}, {pipeline_mode = #tpu.pipeline_mode<synchronous>, transform_indices = @transform_4, window_bounds = array<i64: 128, 1>}, {pipeline_mode = #tpu.pipeline_mode<synchronous>, transform_indices = @transform_5, window_bounds = array<i64: 1, 128>}, {pipeline_mode = #tpu.pipeline_mode<synchronous>, transform_indices = @transform_6, window_bounds = array<i64: 1, 1>}, {transform_indices = @transform_7, window_bounds = array<i64: 1, 1, 128>}]} {
    %c0 = arith.constant 0 : index
    %c0_0 = arith.constant 0 : index
    %0 = vector.load %arg2[%c0, %c0_0] : memref<128x16xbf16, #tpu.memory_space<vmem>>, vector<128x16xbf16>
    %c0_1 = arith.constant 0 : index
    %c0_2 = arith.constant 0 : index
    %1 = vector.load %arg1[%c0_1, %c0_2] : memref<16x128xbf16, #tpu.memory_space<vmem>>, vector<16x128xbf16>
    %cst = arith.constant dense<0.000000e+00> : vector<128x128xf32>
    %2 = tpu.matmul %0, %1, %cst {dimension_numbers = #tpu.dot_dimension_numbers<[1], [0], [0], [1], [0, 0, 1, 1], [], []>} : vector<128x16xbf16>, vector<16x128xbf16>, vector<128x128xf32> -> vector<128x128xf32>
    %c0_3 = arith.constant 0 : index
    %c0_4 = arith.constant 0 : index
    %3 = vector.load %arg3[%c0_3, %c0_4] : memref<128x1xf32, #tpu.memory_space<vmem>>, vector<128x1xf32>
    %4 = vector.broadcast %3 : vector<128x1xf32> to vector<128x128xf32>
    %5 = arith.addf %2, %4 : vector<128x128xf32>
    %cst_5 = arith.constant 0.000000e+00 : f32
    %6 = vector.broadcast %cst_5 : f32 to vector<128x128xf32>
    %7 = arith.maximumf %5, %6 : vector<128x128xf32>
    %c0_6 = arith.constant 0 : index
    %c0_7 = arith.constant 0 : index
    %8 = vector.load %arg4[%c0_6, %c0_7] : memref<128x128xbf16, #tpu.memory_space<vmem>>, vector<128x128xbf16>
    %9 = arith.truncf %7 : vector<128x128xf32> to vector<128x128xbf16>
    %cst_8 = arith.constant dense<0.000000e+00> : vector<128x128xf32>
    %10 = tpu.matmul %8, %9, %cst_8 {dimension_numbers = #tpu.dot_dimension_numbers<[1], [0], [0], [1], [0, 0, 1, 1], [], []>} : vector<128x128xbf16>, vector<128x128xbf16>, vector<128x128xf32> -> vector<128x128xf32>
    %c0_9 = arith.constant 0 : index
    %c0_10 = arith.constant 0 : index
    %11 = vector.load %arg5[%c0_9, %c0_10] : memref<128x1xf32, #tpu.memory_space<vmem>>, vector<128x1xf32>
    %12 = vector.broadcast %11 : vector<128x1xf32> to vector<128x128xf32>
    %13 = arith.addf %10, %12 : vector<128x128xf32>
    %cst_11 = arith.constant 0.000000e+00 : f32
    %14 = vector.broadcast %cst_11 : f32 to vector<128x128xf32>
    %15 = arith.maximumf %13, %14 : vector<128x128xf32>
    %c0_12 = arith.constant 0 : index
    %c0_13 = arith.constant 0 : index
    %16 = vector.load %arg6[%c0_12, %c0_13] : memref<1x128xf32, #tpu.memory_space<vmem>>, vector<1x128xf32>
    %cst_14 = arith.constant dense<0.000000e+00> : vector<1x128xf32>
    %17 = tpu.matmul %16, %15, %cst_14 {dimension_numbers = #tpu.dot_dimension_numbers<[1], [0], [0], [1], [0, 0, 1, 1], [], []>} : vector<1x128xf32>, vector<128x128xf32>, vector<1x128xf32> -> vector<1x128xf32>
    %c0_15 = arith.constant 0 : index
    %c0_16 = arith.constant 0 : index
    %18 = vector.load %arg7[%c0_15, %c0_16] : memref<1x1xf32, #tpu.memory_space<vmem>>, vector<1x1xf32>
    %19 = vector.broadcast %18 : vector<1x1xf32> to vector<1x128xf32>
    %20 = arith.addf %17, %19 : vector<1x128xf32>
    %c0_17 = arith.constant 0 : index
    %c0_18 = arith.constant 0 : index
    %c0_19 = arith.constant 0 : index
    %21 = vector.load %arg8[%c0_17, %c0_18, %c0_19] : memref<1x1x128xf32, #tpu.memory_space<vmem>>, vector<1x1x128xf32>
    %22 = vector.shape_cast %21 : vector<1x1x128xf32> to vector<1x128xf32>
    %23 = vector.shape_cast %20 : vector<1x128xf32> to vector<1x1x128xf32>
    tpu.vector_store %arg8[%c0_17, %c0_18, %c0_19], %23 {strides = array<i32>} : memref<1x1x128xf32, #tpu.memory_space<vmem>>, vector<1x1x128xf32>,
    return
  }
  func.func @transform_0(%arg0: i32) -> (i32, i32) {
    %c0_i32 = arith.constant 0 : i32
    %c0_i32_0 = arith.constant 0 : i32
    return %c0_i32, %arg0 : i32, i32
  }
  func.func @transform_1(%arg0: i32) -> (i32, i32) {
    %c0_i32 = arith.constant 0 : i32
    %c0_i32_0 = arith.constant 0 : i32
    %c0_i32_1 = arith.constant 0 : i32
    return %c0_i32, %c0_i32_0 : i32, i32
  }
  func.func @transform_2(%arg0: i32) -> (i32, i32) {
    %c0_i32 = arith.constant 0 : i32
    %c0_i32_0 = arith.constant 0 : i32
    %c0_i32_1 = arith.constant 0 : i32
    return %c0_i32, %c0_i32_0 : i32, i32
  }
  func.func @transform_3(%arg0: i32) -> (i32, i32) {
    %c0_i32 = arith.constant 0 : i32
    %c0_i32_0 = arith.constant 0 : i32
    %c0_i32_1 = arith.constant 0 : i32
    return %c0_i32, %c0_i32_0 : i32, i32
  }
  func.func @transform_4(%arg0: i32) -> (i32, i32) {
    %c0_i32 = arith.constant 0 : i32
    %c0_i32_0 = arith.constant 0 : i32
    %c0_i32_1 = arith.constant 0 : i32
    return %c0_i32, %c0_i32_0 : i32, i32
  }
  func.func @transform_5(%arg0: i32) -> (i32, i32) {
    %c0_i32 = arith.constant 0 : i32
    %c0_i32_0 = arith.constant 0 : i32
    %c0_i32_1 = arith.constant 0 : i32
    return %c0_i32, %c0_i32_0 : i32, i32
  }
  func.func @transform_6(%arg0: i32) -> (i32, i32) {
    %c0_i32 = arith.constant 0 : i32
    %c0_i32_0 = arith.constant 0 : i32
    %c0_i32_1 = arith.constant 0 : i32
    return %c0_i32, %c0_i32_0 : i32, i32
  }
  func.func @transform_7(%arg0: i32) -> (i32, i32, i32) {
    %c0_i32 = arith.constant 0 : i32
    %c0_i32_0 = arith.constant 0 : i32
    %c0_i32_1 = arith.constant 0 : i32
    return %arg0, %c0_i32, %c0_i32_0 : i32, i32, i32
  }
}

</mosaic_0001>

<bundles_post_ra>
// kernel: tpu_custom_call.1
= control target key start
LH: loop header
LB: loop body
LE: loop exit
PB: predicated region body
PF: predicated region fallthrough
CT: control target
= control target key end

     0   :  { %s1692_s0 = inlined_call_operand.vmem [shape: bf16[16,256], index: 0, kind: input, shape index: {}]   ;;  %s1693_s1 = inlined_call_operand.vmem [shape: bf16[128,16], index: 1, kind: input, shape index: {}]   ;;  %s1694_s2 = inlined_call_operand.vmem [shape: f32[128,1], index: 2, kind: input, shape index: {}]   ;;  %s1695_s3 = inlined_call_operand.vmem [shape: bf16[128,128], index: 3, kind: input, shape index: {}]   ;;  %s1696_s4 = inlined_call_operand.vmem [shape: f32[128,1], index: 4, kind: input, shape index: {}]   ;;  %s1697_s5 = inlined_call_operand.vmem [shape: f32[1,128], index: 5, kind: input, shape index: {}]   ;;  %s1698_s6 = inlined_call_operand.<no memory space> [shape: f32[1,1], index: 6, kind: input, shape index: {}]   ;;  %s1699_s7 = inlined_call_operand.hbm [shape: f32[2,1,128], index: 7, kind: output, shape index: {}]  }
   0x1   :  { %v12_v0 = vstv %s1698_s6 }
   0x2   :  { %13 = vst [vmem:[#allocation2] sm:$0x1] %v12_v0 }
   0x3   :  { %14 = vsyncpa [#allocation5], 0 }
   0x4   :  { %16 = vsyncpa [#allocation5 + $0x1], 0  ;;  %s1419_s26 = smov 0   ;;  %s1421_s27 = smov 0  }
   0x5   :  { %s1423_s28 = smov 0   ;;  %s1425_s29 = smov 0  }
   0x6 LB: > { %s1058_s6 = sadd.s32 4294967295, %s1369_s29   ;;  %s1059_s30 = sadd.s32 4294967294, %s1369_s29   ;;  %s1369_s29 = sphi %s1425_s29, %s1705_s29   ;;  %s1365_s28 = sphi %s1423_s28, %s1704_s28   ;;  %s1361_s27 = sphi %s1421_s27, %s1703_s27   ;;  %s1357_s26 = sphi %s1419_s26, %s1702_s26  }
   0x7   : > { %s1442_s8 = sadd.s32 1, %s1369_s29   ;;  %s29_s9 = sadd.s32 1, %s1365_s28 }
   0x8   : > { %s26_s10 = ssub.s32 %s1369_s29, %s1442_s8  ;;  %p36_p0 = scmp.ne.s32.totalorder %s1365_s28, %s1361_s27 }
   0x9   : > { %p27_p1 = scmp.eq.s32.totalorder %s26_s10, 0  ;;  %p37_p2 = scmp.eq.s32.totalorder %s1369_s29, 0 }
   0xa   : > { %p192_p3 = scmp.eq.s32.totalorder %s1058_s6, 1  ;;  %p197_p4 = scmp.ne.s32.totalorder %s1361_s27, %s1357_s26 }
   0xb   : > { %s1455_s11 = scalar_select %p27_p1, %s1365_s28, %s29_s9  }
   0xc   : > { %p38_p5 = por %p37_p2, %p36_p0  ;;  %p1457_p6 = por %p192_p3, %p36_p0 }
   0xd   : > { %p198_p7 = scmp.eq.s32.totalorder %s1059_s30, 1  ;;  %p1061_p9 = scmp.ge.s32.totalorder %s1369_s29, 2 }
   0xf   : > { %p1461_p8 = por %p198_p7, %p197_p4  ;;  %232 = sbr.rel (%p1061_p9) target bundleno = 29 (0x1d), region = 40 }
  0x16   : > { %235 = sbr.rel (!%p38_p5) target bundleno = 29 (0x1d), region = 44  ;;  %s237_s14 = sand.u32 (%p38_p5), 1, %s1365_s28  }
  0x17   : > { %s1063_s15 = sshll.u32 (%p38_p5), %s1369_s29, 2  ;;  %s1062_s16 = sshll.u32 (%p38_p5), %s237_s14, 3 }
  0x18   : > { %s241_s19 = scalar_lea.vmem (%p38_p5), %s1692_s0, %s1063_s15  ;;  %s239_s20 = scalar_lea.vmem (%p38_p5), [#allocation3], %s1062_s16 }
  0x19   : > { %v257_v1 = vld [vmem:[%s241_s19] sm:$0xf] (%p38_p5)  ;;  %v259_v2 = vld [vmem:[%s241_s19 + $0x8] sm:$0xf] (%p38_p5) }
  0x1a   : > { %258 = vst [vmem:[%s239_s20] sm:$0xf] (%p38_p5), %v257_v1  ;;  %260 = vst [vmem:[%s239_s20 + $0x4] sm:$0xf] (%p38_p5), %v259_v2 }
  0x1d PF: > { %p1064_p10 = scmp.ge.s32.totalorder %s1369_s29, 1  ;;  %p286_p11 = scmp.lt.s32.totalorder %s1369_s29, 3 }
  0x1f   : > { %p287_p12 = pnand %p1064_p10, %p286_p11 }
  0x20   : > { %s1476_s21 = sand.u32 (!%p287_p12), 1, %s1361_s27   ;;  %v1291_v3 = vld [vmem:[%s1693_s1] sm:$0xff] (!%p287_p12)   ;;  %vm484_vm0 = vcmask (!%p287_p12), 130048   ;;  %v1371_v5 = vmov (!%p287_p12), 0   ;;  %v1292_v6 = vld [vmem:[%s1693_s1 + $0x8] sm:$0xff] (!%p287_p12)   ;;  %v1293_v7 = vld [vmem:[%s1693_s1 + $0x10] sm:$0xff] (!%p287_p12)  }
  0x21   : > { %290 = sbr.rel (%p287_p12) target bundleno = 773 (0x305), region = 85  ;;  %s1065_s24 = sshll.u32 (!%p287_p12), %s1476_s21, 3  ;;  %1138 = vmatprep.mubr.msk.bf16.mxu0 (!%p287_p12), %vm484_vm0, %v1291_v3  ;;  %1288 = vset.pattern.permute.xlu0 (!%p287_p12), %v1371_v5  ;;  %v342_v8 = vld [vmem:[%s1694_s2] sm:$0xff] (!%p287_p12)  ;;  %v343_v9 = vld [vmem:[%s1694_s2 + $0x8] sm:$0xff] (!%p287_p12)  ;;  %v344_v10 = vld [vmem:[%s1694_s2 + $0x10] sm:$0xff] (!%p287_p12)  ;;  %vm1373_vm1 = vmmov (!%p287_p12), 0  }
  0x22   : > { %s295_s25 = scalar_lea.vmem (!%p287_p12), [#allocation3], %s1065_s24  ;;  %1289 = vset.pattern.permute.xlu1 (!%p287_p12), %v1371_v5  ;;  %360 = vperm.xlu0 (!%p287_p12), %1288, %v342_v8   ;;  %v345_v11 = vld [vmem:[%s1694_s2 + $0x18] sm:$0xff] (!%p287_p12)  ;;  %v346_v13 = vld [vmem:[%s1694_s2 + $0x20] sm:$0xff] (!%p287_p12)  ;;  %v347_v15 = vld [vmem:[%s1694_s2 + $0x28] sm:$0xff] (!%p287_p12)  ;;  %s1091_s24 = sshll.u32 (!%p287_p12), %s1058_s6, 4 }
  0x23   : > { %v1290_v4 = vld [vmem:[%s295_s25] sm:$0xff] (!%p287_p12)   ;;  %370 = vperm.xlu1 (!%p287_p12), %1289, %v344_v10   ;;  %v1294_v12 = vld [vmem:[%s1693_s1 + $0x18] sm:$0xff] (!%p287_p12)   ;;  %v904_v45 = vld [vmem:[#allocation2] sm:$0x1] (!%p287_p12)  ;;  %s322_s25 = scalar_lea.vmem (!%p287_p12), [#allocation4], %s1476_s21  ;;  %s1648_s14 = scalar_lea.hbm (!%p287_p12), %s1699_s7, %s1091_s24 }
  0x24   : > { %1136 = vmatprep.subr.bf16.mxu0 (!%p287_p12), %v1290_v4  ;;  %v1295_v14 = vld [vmem:[%s1693_s1 + $0x20] sm:$0xff] (!%p287_p12)   ;;  %v348_v16 = vld [vmem:[%s1694_s2 + $0x30] sm:$0xff] (!%p287_p12)  ;;  %v1296_v17 = vld [vmem:[%s1693_s1 + $0x28] sm:$0xff] (!%p287_p12)   ;;  %s998_s30 = sshll.u32 (!%p287_p12), %s322_s25, 4  ;;  %s986_s15 = scalar_lea.sflag (!%p287_p12), [#allocation5], %s1476_s21  ;;  %s1650_s30 = int_to_ptr.vmem [resolvable:$true] %s998_s30 }
  0x25   : > { %1137 = vmatpush3.bf16.msra.mxu0 (!%p287_p12), %v1290_v4  ;;  %v350_v18 = vld [vmem:[%s1694_s2 + $0x40] sm:$0xff] (!%p287_p12)  ;;  %v1297_v19 = vld [vmem:[%s1693_s1 + $0x30] sm:$0xff] (!%p287_p12)   ;;  %v349_v20 = vld [vmem:[%s1694_s2 + $0x38] sm:$0xff] (!%p287_p12)  ;;  %s1307_s16 = scalar_lea.vmem (!%p287_p12), %s1650_s30, 16  ;;  %s1375_s6 = smov (!%p287_p12), [#allocation4]  }
  0x26   : > { %365 = vperm.xlu0 (!%p287_p12), %1288, %v343_v9   ;;  %v351_v21 = vld [vmem:[%s1694_s2 + $0x48] sm:$0xff] (!%p287_p12)  ;;  %v352_v22 = vld [vmem:[%s1694_s2 + $0x50] sm:$0xff] (!%p287_p12)  ;;  %v353_v23 = vld [vmem:[%s1694_s2 + $0x58] sm:$0xff] (!%p287_p12)  ;;  %p1308_p13 = scmp.ne.s32.totalorder (!%p287_p12), %s1650_s30, %s1307_s16  ;;  %s1311_s17 = sshll.u32 (!%p287_p12), %s1375_s6, 4  ;;  %s1312_s17 = int_to_ptr.vmem [resolvable:$false] %s1311_s17 }
  0x27   : > { %375 = vperm.xlu1 (!%p287_p12), %1289, %v345_v11   ;;  %v1298_v24 = vld [vmem:[%s1693_s1 + $0x38] sm:$0xff] (!%p287_p12)   ;;  %v354_v25 = vld [vmem:[%s1694_s2 + $0x60] sm:$0xff] (!%p287_p12)  ;;  %v355_v26 = vld [vmem:[%s1694_s2 + $0x68] sm:$0xff] (!%p287_p12)  ;;  %s1313_s18 = scalar_lea.vmem (!%p287_p12), %s1312_s17, 32  ;;  %p1314_p2 = scmp.lt.s32.totalorder (!%p287_p12), %s1650_s30, %s1312_s17 }
  0x28   : > { %1139 = vmatmul.mubr.msk.bf16.vlgmr.msra.gmra.mrb[0].mxu0 %vm484_vm0, %v1292_v6  ;;  %v356_v27 = vld [vmem:[%s1694_s2 + $0x70] sm:$0xff]  ;;  %v357_v28 = vld [vmem:[%s1694_s2 + $0x78] sm:$0xff]  ;;  %v646_v29 = vld [vmem:[%s1696_s4] sm:$0xff]  ;;  %p1309_p0 = pnand %p1308_p13, %p1457_p6  ;;  %p1315_p3 = scmp.lt.s32.totalorder %s1313_s18, %s1307_s16 }
  0x29   : > { %1142 = vmatprep.mubr.msk.bf16.mxu0 %vm484_vm0, %v1293_v7  ;;  %v647_v30 = vld [vmem:[%s1696_s4 + $0x8] sm:$0xff]  ;;  %v648_v31 = vld [vmem:[%s1696_s4 + $0x10] sm:$0xff]  ;;  %v649_v32 = vld [vmem:[%s1696_s4 + $0x18] sm:$0xff] }
  0x2a   : > { %380 = vperm.xlu0 %1288, %v346_v13   ;;  %v650_v33 = vld [vmem:[%s1696_s4 + $0x20] sm:$0xff]  ;;  %v651_v34 = vld [vmem:[%s1696_s4 + $0x28] sm:$0xff]  ;;  %v652_v35 = vld [vmem:[%s1696_s4 + $0x30] sm:$0xff]  ;;  %p1310_p1 = pneg %p1309_p0  ;;  %p1316_p4 = por %p1315_p3, %p1314_p2 }
  0x2b   : > { %385 = vperm.xlu1 %1289, %v347_v15   ;;  %v653_v36 = vld [vmem:[%s1696_s4 + $0x38] sm:$0xff]  ;;  %v654_v37 = vld [vmem:[%s1696_s4 + $0x40] sm:$0xff]  ;;  %v655_v38 = vld [vmem:[%s1696_s4 + $0x48] sm:$0xff] }
  0x2c   : > { %v656_v39 = vld [vmem:[%s1696_s4 + $0x50] sm:$0xff]  ;;  %v657_v40 = vld [vmem:[%s1696_s4 + $0x58] sm:$0xff]  ;;  %v658_v41 = vld [vmem:[%s1696_s4 + $0x60] sm:$0xff]  ;;  %p1317_p5 = pnand %p1316_p4, %p1310_p1 }
  0x2d   : > { %v659_v42 = vld [vmem:[%s1696_s4 + $0x68] sm:$0xff]  ;;  %v660_v43 = vld [vmem:[%s1696_s4 + $0x70] sm:$0xff]  ;;  %v661_v44 = vld [vmem:[%s1696_s4 + $0x78] sm:$0xff] }
  0x2e   : > { %390 = vperm.xlu0 %1288, %v348_v16   ;;  %v1299_v46 = vld [vmem:[%s1695_s3] sm:$0xff]  }
  0x2f   : > { %395 = vperm.xlu1 %1289, %v349_v20   ;;  %1170 = vmatprep.mubr.bf16.mxu1 %v1299_v46 }
  0x30   : > { %1143 = vmatmul.mubr.msk.bf16.gmra.mrb[4].mxu0 %vm484_vm0, %v1294_v12 }
  0x31   : > { %1146 = vmatprep.mubr.msk.bf16.mxu0 %vm484_vm0, %v1295_v14 }
  0x32   : > { %400 = vperm.xlu0 %1288, %v350_v18  }
  0x33   : > { %405 = vperm.xlu1 %1289, %v351_v21  }
  0x36   : > { %410 = vperm.xlu0 %1288, %v352_v22  }
  0x37   : > { %415 = vperm.xlu1 %1289, %v353_v23  }
  0x38   : > { %1147 = vmatmul.mubr.msk.bf16.gmra.mrb[8].mxu0 %vm484_vm0, %v1296_v17 }
  0x39   : > { %1150 = vmatprep.mubr.msk.bf16.mxu0 %vm484_vm0, %v1297_v19 }
  0x3a   : > { %420 = vperm.xlu0 %1288, %v354_v25  }
  0x3b   : > { %425 = vperm.xlu1 %1289, %v355_v26  }
  0x3e   : > { %430 = vperm.xlu0 %1288, %v356_v27  }
  0x3f   : > { %435 = vperm.xlu1 %1289, %v357_v28  }
  0x40   : > { %1151 = vmatmul.mubr.msk.bf16.gmra.mrb[12].mxu0 %vm484_vm0, %v1298_v24 }
  0x42   : > { %664 = vperm.xlu0 %1288, %v646_v29  }
  0x43   : > { %669 = vperm.xlu1 %1289, %v647_v30  }
  0x46   : > { %674 = vperm.xlu0 %1288, %v648_v31  }
  0x47   : > { %679 = vperm.xlu1 %1289, %v649_v32  }
  0x4a   : > { %684 = vperm.xlu0 %1288, %v650_v33  }
  0x4b   : > { %689 = vperm.xlu1 %1289, %v651_v34  }
  0x4e   : > { %694 = vperm.xlu0 %1288, %v652_v35  }
  0x4f   : > { %699 = vperm.xlu1 %1289, %v653_v36  }
  0x52   : > { %704 = vperm.xlu0 %1288, %v654_v37  }
  0x53   : > { %709 = vperm.xlu1 %1289, %v655_v38  }
  0x56   : > { %714 = vperm.xlu0 %1288, %v656_v39  }
  0x57   : > { %719 = vperm.xlu1 %1289, %v657_v40  }
  0x5a   : > { %724 = vperm.xlu0 %1288, %v658_v41  }
  0x5b   : > { %729 = vperm.xlu1 %1289, %v659_v42  }
  0x5e   : > { %734 = vperm.xlu0 %1288, %v660_v43  }
  0x5f   : > { %739 = vperm.xlu1 %1289, %v661_v44  }
  0x62   : > { %907 = vperm.xlu0 %1288, %v904_v45  }
  0xa1   : > { %v361_v47 = vpop.permute.xlu0 %360 }
  0xa2   : > { %v371_v48 = vpop.permute.xlu1 %370 }
  0xa5   : > { %v366_v49 = vpop.permute.xlu0 %365 }
  0xa6   : > { %v376_v50 = vpop.permute.xlu1 %375 }
  0xa9   : > { %v381_v51 = vpop.permute.xlu0 %380 }
  0xaa   : > { %v386_v52 = vpop.permute.xlu1 %385 }
  0xad   : > { %v391_v53 = vpop.permute.xlu0 %390 }
  0xae   : > { %v396_v57 = vpop.permute.xlu1 %395 }
  0xb1   : > { %v401_v1 = vpop.permute.xlu0 %400 }
  0xb2   : > { %v406_v5 = vpop.permute.xlu1 %405 }
  0xb5   : > { %v411_v14 = vpop.permute.xlu0 %410 }
  0xb6   : > { %v416_v18 = vpop.permute.xlu1 %415 }
  0xb9   : > { %v421_v26 = vpop.permute.xlu0 %420 }
  0xba   : > { %v426_v31 = vpop.permute.xlu1 %425 }
  0xbd   : > { %v431_v38 = vpop.permute.xlu0 %430 }
  0xbe   : > { %v436_v43 = vpop.permute.xlu1 %435 }
  0xfb   : > { %v1140_v54 = vpop.f32.mrb[0].mxu0 }
  0xfc   : > { %v552_v55 = vadd.f32 %v1140_v54, %v371_v48  ;;  %v543_v56 = vpop.f32.mrb[1].mxu0 }
  0xfd   : > { %v544_v58 = vadd.f32 %v543_v56, %v361_v47  ;;  %v1141_v59 = vpop.f32.mrb[2].mxu0  ;;  %v1301_v56 = vld [vmem:[%s1695_s3 + $0x10] sm:$0xff]  }
  0xfe   : > { %v555_v60 = vadd.f32 %v1141_v59, %v376_v50  ;;  %v546_v61 = vpop.f32.mrb[3].mxu0  ;;  %v608_v63 = vmax.f32 %v552_v55, 0.0  ;;  %v1300_v55 = vld [vmem:[%s1695_s3 + $0x8] sm:$0xff]  }
  0xff   : > { %v547_v62 = vadd.f32 %v546_v61, %v366_v49  ;;  %v606_v2 = vmax.f32 %v544_v58, 0.0  ;;  %v1303_v58 = vld [vmem:[%s1695_s3 + $0x20] sm:$0xff]   ;;  %v1304_v59 = vld [vmem:[%s1695_s3 + $0x28] sm:$0xff]   ;;  %v1306_v61 = vld [vmem:[%s1695_s3 + $0x38] sm:$0xff]  }
 0x100   : > { %v609_v0 = vmax.f32 %v555_v60, 0.0  ;;  %v1305_v60 = vld [vmem:[%s1695_s3 + $0x30] sm:$0xff]  }
 0x101   : > { %v607_v3 = vmax.f32 %v547_v62, 0.0  ;;  %v1372_v62 = vmov 0.0|0.0  }
 0x102   : > { %v639_v4 = vpack.c.bf16 %v609_v0, %v608_v63  ;;  %1221 = vmatprep.subr.bf16.mxu0 %v1372_v62  ;;  %v1374_v63 = vmov 0.0   ;;  %v665_v0 = vpop.permute.xlu0 %664 }
 0x103   : > { %v1144_v6 = vpop.f32.mrb[4].mxu0  ;;  %v638_v7 = vpack.c.bf16 %v607_v3, %v606_v2  ;;  %1218 = vmatprep.mubr.msk.f32.mxu0 %vm1373_vm1, %v1374_v63 }
 0x104   : > { %v568_v8 = vadd.f32 %v1144_v6, %v391_v53  ;;  %v559_v9 = vpop.f32.mrb[5].mxu0 }
 0x105   : > { %v560_v10 = vadd.f32 %v559_v9, %v381_v51  ;;  %v1145_v11 = vpop.f32.mrb[6].mxu0  ;;  %1154 = vmatprep.subr.bf16.mxu1 %v638_v7 }
 0x106   : > { %v571_v12 = vadd.f32 %v1145_v11, %v396_v57  ;;  %v562_v13 = vpop.f32.mrb[7].mxu0  ;;  %1155 = vmatpush3.bf16.msra.mxu1 %v638_v7  ;;  %v612_v16 = vmax.f32 %v568_v8, 0.0  ;;  %v1302_v57 = vld [vmem:[%s1695_s3 + $0x18] sm:$0xff]   ;;  %v675_v2 = vpop.permute.xlu0 %674 }
 0x107   : > { %v563_v15 = vadd.f32 %v562_v13, %v386_v52  ;;  %1156 = vmatprep.subr.bf16.mxu1 %v639_v4  ;;  %v610_v19 = vmax.f32 %v560_v10, 0.0 }
 0x108   : > { %v613_v17 = vmax.f32 %v571_v12, 0.0 }
 0x109   : > { %v611_v20 = vmax.f32 %v563_v15, 0.0 }
 0x10a   : > { %v641_v21 = vpack.c.bf16 %v613_v17, %v612_v16  ;;  %1157 = vmatpush3.bf16.msra.mxu1 %v639_v4  ;;  %v685_v4 = vpop.permute.xlu0 %684 }
 0x10b   : > { %v640_v22 = vpack.c.bf16 %v611_v20, %v610_v19  ;;  %v1148_v23 = vpop.f32.mrb[8].mxu0 }
 0x10c   : > { %v584_v24 = vadd.f32 %v1148_v23, %v411_v14  ;;  %v575_v25 = vpop.f32.mrb[9].mxu0 }
 0x10d   : > { %v576_v27 = vadd.f32 %v575_v25, %v401_v1  ;;  %v1149_v28 = vpop.f32.mrb[10].mxu0  ;;  %1158 = vmatprep.subr.bf16.mxu1 %v640_v22  ;;  %v670_v1 = vpop.permute.xlu1 %669 }
 0x10e   : > { %v587_v29 = vadd.f32 %v1149_v28, %v416_v18  ;;  %v578_v30 = vpop.f32.mrb[11].mxu0  ;;  %1159 = vmatpush3.bf16.msra.mxu1 %v640_v22  ;;  %v616_v33 = vmax.f32 %v584_v24, 0.0  ;;  %v695_v6 = vpop.permute.xlu0 %694 }
 0x10f   : > { %v579_v32 = vadd.f32 %v578_v30, %v406_v5  ;;  %1160 = vmatprep.subr.bf16.mxu1 %v641_v21  ;;  %v614_v35 = vmax.f32 %v576_v27, 0.0 }
 0x110   : > { %v617_v34 = vmax.f32 %v587_v29, 0.0 }
 0x111   : > { %v615_v36 = vmax.f32 %v579_v32, 0.0  ;;  %v680_v3 = vpop.permute.xlu1 %679 }
 0x112   : > { %v643_v37 = vpack.c.bf16 %v617_v34, %v616_v33  ;;  %1161 = vmatpush3.bf16.msra.mxu1 %v641_v21  ;;  %v705_v18 = vpop.permute.xlu0 %704 }
 0x113   : > { %v642_v39 = vpack.c.bf16 %v615_v36, %v614_v35  ;;  %v1152_v40 = vpop.f32.mrb[12].mxu0 }
 0x114   : > { %v600_v41 = vadd.f32 %v1152_v40, %v431_v38  ;;  %v591_v42 = vpop.f32.mrb[13].mxu0 }
 0x115   : > { %v592_v44 = vadd.f32 %v591_v42, %v421_v26  ;;  %v1153_v45 = vpop.f32.mrb[14].mxu0  ;;  %1162 = vmatprep.subr.bf16.mxu1 %v642_v39  ;;  %v690_v5 = vpop.permute.xlu1 %689 }
 0x116   : > { %v603_v46 = vadd.f32 %v1153_v45, %v436_v43  ;;  %v594_v47 = vpop.f32.mrb[15].mxu0  ;;  %1163 = vmatpush3.bf16.msra.mxu1 %v642_v39  ;;  %v620_v49 = vmax.f32 %v600_v41, 0.0 }
 0x117   : > { %v595_v48 = vadd.f32 %v594_v47, %v426_v31  ;;  %1164 = vmatprep.subr.bf16.mxu1 %v643_v37  ;;  %v618_v51 = vmax.f32 %v592_v44, 0.0  ;;  %v715_v31 = vpop.permute.xlu0 %714 }
 0x118   : > { %v621_v50 = vmax.f32 %v603_v46, 0.0 }
 0x119   : > { %v619_v52 = vmax.f32 %v595_v48, 0.0  ;;  %v700_v10 = vpop.permute.xlu1 %699 }
 0x11a   : > { %v645_v53 = vpack.c.bf16 %v621_v50, %v620_v49  ;;  %1165 = vmatpush3.bf16.msra.mxu1 %v643_v37 }
 0x11b   : > { %v644_v54 = vpack.c.bf16 %v619_v52, %v618_v51  ;;  %v725_v43 = vpop.permute.xlu0 %724 }
 0x11d   : > { %1166 = vmatprep.subr.bf16.mxu1 %v644_v54  ;;  %v710_v22 = vpop.permute.xlu1 %709 }
 0x11e   : > { %1167 = vmatpush3.bf16.msra.mxu1 %v644_v54 }
 0x11f   : > { %1168 = vmatprep.subr.bf16.mxu1 %v645_v53 }
 0x121   : > { %v720_v35 = vpop.permute.xlu1 %719 }
 0x122   : > { %1169 = vmatpush3.bf16.msra.mxu1 %v645_v53 }
 0x125   : > { %1171 = vmatmul.mubr.bf16.vlgmr.msra.gmra.mrb[0].mxu1 %v1300_v55  ;;  %v730_v48 = vpop.permute.xlu1 %729  ;;  %v735_v55 = vpop.permute.xlu0 %734 }
 0x126   : > { %1174 = vmatprep.mubr.bf16.mxu1 %v1301_v56 }
 0x12d   : > { %1175 = vmatmul.mubr.bf16.gmra.mrb[4].mxu1 %v1302_v57 }
 0x12e   : > { %1178 = vmatprep.mubr.bf16.mxu1 %v1303_v58 }
 0x135   : > { %1179 = vmatmul.mubr.bf16.gmra.mrb[8].mxu1 %v1304_v59 }
 0x136   : > { %1182 = vmatprep.mubr.bf16.mxu1 %v1305_v60  ;;  %v740_v60 = vpop.permute.xlu1 %739 }
 0x13d   : > { %1183 = vmatmul.mubr.bf16.gmra.mrb[12].mxu1 %v1306_v61 }
 0x1f8   : > { %v1172_v7 = vpop.f32.mrb[0].mxu1 }
 0x1f9   : > { %v833_v8 = vadd.f32 %v1172_v7, %v675_v2  ;;  %v824_v9 = vpop.f32.mrb[1].mxu1 }
 0x1fa   : > { %v825_v11 = vadd.f32 %v824_v9, %v665_v0  ;;  %v1173_v12 = vpop.f32.mrb[2].mxu1  ;;  %v903_v9 = vld [vmem:[%s1697_s5] sm:$0x1] }
 0x1fb   : > { %v836_v13 = vadd.f32 %v1173_v12, %v680_v3  ;;  %v827_v14 = vpop.f32.mrb[3].mxu1  ;;  %v889_v16 = vmax.f32 %v833_v8, 0.0 }
 0x1fc   : > { %v828_v15 = vadd.f32 %v827_v14, %v670_v1  ;;  %v887_v19 = vmax.f32 %v825_v11, 0.0 }
 0x1fd   : > { %v890_v17 = vmax.f32 %v836_v13, 0.0  ;;  %v908_v13 = vpop.permute.xlu0 %907 }
 0x1fe   : > { %v888_v20 = vmax.f32 %v828_v15, 0.0 }
 0x1ff   : > { %v1225_v21 = vpack.c.bf16 %v890_v17, %v889_v16 }
 0x200   : > { %v1222_v23 = vpack.c.bf16 %v888_v20, %v887_v19  ;;  %v1176_v24 = vpop.f32.mrb[4].mxu1 }
 0x201   : > { %v849_v25 = vadd.f32 %v1176_v24, %v695_v6  ;;  %v840_v26 = vpop.f32.mrb[5].mxu1 }
 0x202   : > { %v841_v27 = vadd.f32 %v840_v26, %v685_v4  ;;  %v1177_v28 = vpop.f32.mrb[6].mxu1  ;;  %1223 = vmatpush3.bf16.msra.mxu0 %v1222_v23 }
 0x203   : > { %v852_v29 = vadd.f32 %v1177_v28, %v700_v10  ;;  %v843_v30 = vpop.f32.mrb[7].mxu1  ;;  %1224 = vmatprep.subr.bf16.mxu0 %v1372_v62  ;;  %v893_v33 = vmax.f32 %v849_v25, 0.0  ;;  %v910_v10 = vlaneseq }
 0x204   : > { %v844_v32 = vadd.f32 %v843_v30, %v690_v5  ;;  %v891_v36 = vmax.f32 %v841_v27, 0.0 }
 0x205   : > { %v894_v34 = vmax.f32 %v852_v29, 0.0  ;;  %v911_v11 = vshrl.u32 %v910_v10, 7 }
 0x206   : > { %v892_v37 = vmax.f32 %v844_v32, 0.0  ;;  %1226 = vmatpush3.bf16.msra.mxu0 %v1225_v21 }
 0x207   : > { %v1231_v38 = vpack.c.bf16 %v894_v34, %v893_v33  ;;  %1227 = vmatprep.subr.bf16.mxu0 %v1372_v62  ;;  %v912_v12 = vsub.s32 0, %v911_v11 }
 0x208   : > { %v1228_v39 = vpack.c.bf16 %v892_v37, %v891_v36  ;;  %v1180_v40 = vpop.f32.mrb[8].mxu1 }
 0x209   : > { %v865_v41 = vadd.f32 %v1180_v40, %v715_v31  ;;  %v856_v42 = vpop.f32.mrb[9].mxu1  ;;  %v913_v14 = vrot.slane %v908_v13, %v912_v12 }
 0x20a   : > { %v857_v44 = vadd.f32 %v856_v42, %v705_v18  ;;  %v1181_v45 = vpop.f32.mrb[10].mxu1  ;;  %1229 = vmatpush3.bf16.msra.mxu0 %v1228_v39 }
 0x20b   : > { %v868_v46 = vadd.f32 %v1181_v45, %v720_v35  ;;  %v859_v47 = vpop.f32.mrb[11].mxu1  ;;  %1230 = vmatprep.subr.bf16.mxu0 %v1372_v62  ;;  %v897_v50 = vmax.f32 %v865_v41, 0.0 }
 0x20c   : > { %v860_v49 = vadd.f32 %v859_v47, %v710_v22  ;;  %v895_v52 = vmax.f32 %v857_v44, 0.0 }
 0x20d   : > { %v898_v51 = vmax.f32 %v868_v46, 0.0 }
 0x20e   : > { %v896_v53 = vmax.f32 %v860_v49, 0.0  ;;  %1232 = vmatpush3.bf16.msra.mxu0 %v1231_v38 }
 0x20f   : > { %v1237_v54 = vpack.c.bf16 %v898_v51, %v897_v50  ;;  %1233 = vmatprep.subr.bf16.mxu0 %v1372_v62 }
 0x210   : > { %v1234_v56 = vpack.c.bf16 %v896_v53, %v895_v52  ;;  %v1184_v57 = vpop.f32.mrb[12].mxu1 }
 0x211   : > { %v881_v58 = vadd.f32 %v1184_v57, %v735_v55  ;;  %v872_v59 = vpop.f32.mrb[13].mxu1 }
 0x212   : > { %v873_v61 = vadd.f32 %v872_v59, %v725_v43  ;;  %v1185_v63 = vpop.f32.mrb[14].mxu1  ;;  %1235 = vmatpush3.bf16.msra.mxu0 %v1234_v56 }
 0x213   : > { %v884_v0 = vadd.f32 %v1185_v63, %v740_v60  ;;  %v875_v1 = vpop.f32.mrb[15].mxu1  ;;  %1236 = vmatprep.subr.bf16.mxu0 %v1372_v62  ;;  %v901_v3 = vmax.f32 %v881_v58, 0.0 }
 0x214   : > { %v876_v2 = vadd.f32 %v875_v1, %v730_v48  ;;  %v899_v5 = vmax.f32 %v873_v61, 0.0 }
 0x215   : > { %v902_v4 = vmax.f32 %v884_v0, 0.0 }
 0x216   : > { %v900_v6 = vmax.f32 %v876_v2, 0.0  ;;  %1238 = vmatpush3.bf16.msra.mxu0 %v1237_v54 }
 0x217   : > { %v1243_v7 = vpack.c.bf16 %v902_v4, %v901_v3  ;;  %1239 = vmatprep.subr.bf16.mxu0 %v1372_v62 }
 0x218   : > { %v1240_v8 = vpack.c.bf16 %v900_v6, %v899_v5 }
 0x21a   : > { %1241 = vmatpush3.bf16.msra.mxu0 %v1240_v8 }
 0x21b   : > { %1242 = vmatprep.subr.bf16.mxu0 %v1372_v62 }
 0x21e   : > { %1244 = vmatpush3.bf16.msra.mxu0 %v1243_v7 }
 0x221   : > { %1219 = vmatmul.mubr.f32.vlgmr.msra.gmra.mrb[16].mxu0 %v903_v9 }
 0x2f4   : > { %v980_v15 = vpop.f32.mrb[16].mxu0 }
 0x2f5   : > { %v981_v16 = vadd.f32 %v980_v15, %v913_v14  ;;  %v1220_v62 = vpop.f32.mrb[17].mxu0 }
 0x2f7   : > { %984 = vst [vmem:[%s322_s25] sm:$0x1] %v981_v16 }
 0x2f8   : > { %1320 = shalt.err (!%p1317_p5)
}
 0x2f9   : > { %s1321_s21 = scalar_lea.hbm %s1648_s14, 16  ;;  %s1325_s22 = scalar_lea.hbm %s1699_s7, 32 }
 0x2fa   : > { %p1322_p7 = scmp.ne.s32.totalorder %s1648_s14, %s1321_s21  ;;  %p1326_p12 = scmp.lt.u32.totalorder %s1648_s14, %s1699_s7 }
 0x2fb   : > { %p1327_p13 = scmp.lt.u32.totalorder %s1325_s22, %s1321_s21  ;;  %p1329_p1 = scmp.lt.u32.totalorder %s1321_s21, %s1648_s14 }
 0x2fc   : > { %p1323_p10 = pnand %p1322_p7, %p1457_p6 }
 0x2fd   : > { %p1328_p0 = por %p1327_p13, %p1326_p12 }
 0x2fe   : > { %p1324_p11 = pneg %p1323_p10 }
 0x2ff   : > { %p1330_p2 = por %p1329_p1, %p1328_p0 }
 0x301   : > { %p1331_p3 = pnand %p1330_p2, %p1324_p11 }
 0x303   : > { %1334 = shalt.err (!%p1331_p3)
}
 0x304   : > { %1245 = dma.vmem_to_hbm [thread:$0]  (%p1457_p6), %s1650_s30, 16, %s1648_s14, %s986_s15  }
 0x305 PF: > { %s1010_s25 = sand.u32 1, %s1357_s26   ;;  %p1248_p4 = pnand %p1061_p9, %p1461_p8 }
 0x306   : > { %s1011_s9 = scalar_lea.sflag [#allocation5], %s1010_s25 }
 0x307   : > { %1352 = dma.done.wait (!%p1248_p4), %s1011_s9, 16  }
 0x308   : > { %1354 = vsyncadd (!%p1248_p4), %s1011_s9, 4294967280  ;;  %p19_p5 = scmp.ge.s32.totalorder %s1442_s8, 4   ;;  %s1702_s26 = smov %s1361_s27 }
 0x309   : > { %s1703_s27 = smov %s1365_s28  ;;  %s1704_s28 = smov %s1455_s11 }
 0x30a   : > { %s1705_s29 = smov %s1442_s8  ;;  %21 = sbr.rel (!%p19_p5) target bundleno = 6 (0x6), region = 129 }
 0x311   :  { %1015 = vsyncpa [#allocation5], 1 }
 0x312   :  { %1017 = vsyncpa [#allocation5 + $0x1], 1 }

</bundles_post_ra>
